<compile_context>
chip_gen: v6e
topology: v6e:2x2x1
jax: 0.10.0
libtpu: 0.0.40
codegen_flags: <defaults>
</compile_context>

<pallas_src>
import functools

import jax
import jax.numpy as jnp
import numpy as np
from jax.experimental import pallas as pl
from jax.experimental.pallas import tpu as pltpu

EPS = 1e-5  # module default


# ----------------------------------- Pallas kernel ---------------------------
def adain_kernel(x_ref, w_ref, b_ref, o_ref, *, hw):
    x = x_ref[0].astype(jnp.float32)     # (C, HW)  spatial on the lane axis
    w = w_ref[0].astype(jnp.float32)     # (C, 1)   adaptive scale (style)
    b = b_ref[0].astype(jnp.float32)     # (C, 1)   adaptive shift (style)

    # One pass over the activation: sum and sum-of-squares per channel.
    s = jnp.sum(x, axis=1, keepdims=True)         # (C, 1)
    ss = jnp.sum(x * x, axis=1, keepdims=True)    # (C, 1)

    mean = s * (1.0 / hw)
    # torch.Tensor.std default is unbiased: divide by (HW - 1).
    var = jnp.maximum(ss - mean * s, 0.0) * (1.0 / (hw - 1.0))
    std = jnp.sqrt(var)

    # Module adds eps to the *std* (not the variance).
    scale = w / (std + EPS)
    o_ref[0] = ((x - mean) * scale + b).astype(o_ref.dtype)


# ----------------------------------- wrapper ---------------------------------
def adaptive_instance_norm_2d(x_nchw, weight, bias):
    """x: (N, C, H, W); weight/bias: (N, C) externally-assigned AdaIN params."""
    N, C, H, W = x_nchw.shape
    HW = H * W

    # Layout plumbing in the wrapper (free in XLA), never inside the kernel.
    x_flat = x_nchw.reshape(N, C, HW)
    w3 = weight.reshape(N, C, 1)
    b3 = bias.reshape(N, C, 1)

    kernel = functools.partial(adain_kernel, hw=float(HW))
    out_flat = pl.pallas_call(
        kernel,
        out_shape=jax.ShapeDtypeStruct((N, C, HW), x_nchw.dtype),
        grid=(N,),
        in_specs=[
            pl.BlockSpec((1, C, HW), lambda n: (n, 0, 0)),
            pl.BlockSpec((1, C, 1), lambda n: (n, 0, 0)),
            pl.BlockSpec((1, C, 1), lambda n: (n, 0, 0)),
        ],
        out_specs=pl.BlockSpec((1, C, HW), lambda n: (n, 0, 0)),
        compiler_params=pltpu.CompilerParams(
            dimension_semantics=("parallel",)),
    )(x_flat, w3, b3)
    return out_flat.reshape(N, C, H, W)


# ----------------------------------- pure-JAX reference ----------------------
def adain_reference(x_nchw, weight, bias, eps=EPS):
    N, C, H, W = x_nchw.shape
    xf = x_nchw.reshape(N, C, -1)
    mean = jnp.mean(xf, axis=-1, keepdims=True)
    std = jnp.std(xf, axis=-1, keepdims=True, ddof=1)   # torch unbiased std
    out = (xf - mean) / (std + eps) * weight.reshape(N, C, 1) \
        + bias.reshape(N, C, 1)
    return out.reshape(N, C, H, W)


# ----------------------------------------- main -------------------------------
if __name__ == "__main__":
    N, C, H, W = 2, 4, 16, 16
    key = jax.random.PRNGKey(0)
    kx, kw, kb = jax.random.split(key, 3)

    x = jax.random.normal(kx, (N, C, H, W), jnp.float32)
    # AdaIN style parameters (assigned externally in the original framework;
    # modeled as per-sample per-channel arrays).
    weight = jax.random.normal(kw, (N, C), jnp.float32)
    bias = jax.random.normal(kb, (N, C), jnp.float32)

    out = adaptive_instance_norm_2d(x, weight, bias)
    out = jax.block_until_ready(out)

    ref = adain_reference(x, weight, bias)
    np.testing.assert_allclose(np.asarray(out), np.asarray(ref),
                               rtol=2e-4, atol=2e-4)

    print("KERNEL_OK")
</pallas_src>

<mosaic_0001>
module attributes {stable_mosaic.version = 11 : i64} {
  func.func @adain_kernel(%arg0: i32, %arg1: memref<1x4x256xf32, #tpu.memory_space<vmem>>, %arg2: memref<1x4x1xf32, #tpu.memory_space<vmem>>, %arg3: memref<1x4x1xf32, #tpu.memory_space<vmem>>, %arg4: memref<1x4x256xf32, #tpu.memory_space<vmem>>) attributes {dimension_semantics = [#tpu.dimension_semantics<parallel>], iteration_bounds = array<i64: 2>, scalar_prefetch = 0 : i64, scratch_operands = 0 : i64, tpu.core_type = #tpu.core_type<tc>, window_params = [{transform_indices = @transform_0, window_bounds = array<i64: 1, 4, 256>}, {transform_indices = @transform_1, window_bounds = array<i64: 1, 4, 1>}, {transform_indices = @transform_2, window_bounds = array<i64: 1, 4, 1>}, {transform_indices = @transform_3, window_bounds = array<i64: 1, 4, 256>}]} {
    %c0 = arith.constant 0 : index
    %c0_0 = arith.constant 0 : index
    %c0_1 = arith.constant 0 : index
    %0 = vector.load %arg1[%c0, %c0_0, %c0_1] : memref<1x4x256xf32, #tpu.memory_space<vmem>>, vector<1x4x256xf32>
    %1 = vector.shape_cast %0 : vector<1x4x256xf32> to vector<4x256xf32>
    %c0_2 = arith.constant 0 : index
    %c0_3 = arith.constant 0 : index
    %c0_4 = arith.constant 0 : index
    %2 = vector.load %arg2[%c0_2, %c0_3, %c0_4] : memref<1x4x1xf32, #tpu.memory_space<vmem>>, vector<1x4x1xf32>
    %3 = vector.shape_cast %2 : vector<1x4x1xf32> to vector<4x1xf32>
    %c0_5 = arith.constant 0 : index
    %c0_6 = arith.constant 0 : index
    %c0_7 = arith.constant 0 : index
    %4 = vector.load %arg3[%c0_5, %c0_6, %c0_7] : memref<1x4x1xf32, #tpu.memory_space<vmem>>, vector<1x4x1xf32>
    %5 = vector.shape_cast %4 : vector<1x4x1xf32> to vector<4x1xf32>
    %cst = arith.constant dense<0.000000e+00> : vector<4xf32>
    %6 = vector.multi_reduction <add>, %1, %cst [1] : vector<4x256xf32> to vector<4xf32>
    %7 = vector.shape_cast %6 : vector<4xf32> to vector<4x1xf32>
    %8 = arith.mulf %1, %1 : vector<4x256xf32>
    %cst_8 = arith.constant dense<0.000000e+00> : vector<4xf32>
    %9 = vector.multi_reduction <add>, %8, %cst_8 [1] : vector<4x256xf32> to vector<4xf32>
    %10 = vector.shape_cast %9 : vector<4xf32> to vector<4x1xf32>
    %cst_9 = arith.constant 3.906250e-03 : f32
    %11 = vector.broadcast %cst_9 : f32 to vector<4x1xf32>
    %12 = arith.mulf %7, %11 : vector<4x1xf32>
    %13 = arith.mulf %12, %7 : vector<4x1xf32>
    %14 = arith.subf %10, %13 : vector<4x1xf32>
    %cst_10 = arith.constant 0.000000e+00 : f32
    %15 = vector.broadcast %cst_10 : f32 to vector<4x1xf32>
    %16 = arith.maximumf %14, %15 : vector<4x1xf32>
    %cst_11 = arith.constant 0.00392156886 : f32
    %17 = vector.broadcast %cst_11 : f32 to vector<4x1xf32>
    %18 = arith.mulf %16, %17 : vector<4x1xf32>
    %19 = math.sqrt %18 : vector<4x1xf32>
    %cst_12 = arith.constant 9.99999974E-6 : f32
    %20 = vector.broadcast %cst_12 : f32 to vector<4x1xf32>
    %21 = arith.addf %19, %20 : vector<4x1xf32>
    %22 = arith.divf %3, %21 : vector<4x1xf32>
    %23 = vector.broadcast %12 : vector<4x1xf32> to vector<4x256xf32>
    %24 = arith.subf %1, %23 : vector<4x256xf32>
    %25 = vector.broadcast %22 : vector<4x1xf32> to vector<4x256xf32>
    %26 = arith.mulf %24, %25 : vector<4x256xf32>
    %27 = vector.broadcast %5 : vector<4x1xf32> to vector<4x256xf32>
    %28 = arith.addf %26, %27 : vector<4x256xf32>
    %c0_13 = arith.constant 0 : index
    %c0_14 = arith.constant 0 : index
    %c0_15 = arith.constant 0 : index
    %29 = vector.load %arg4[%c0_13, %c0_14, %c0_15] : memref<1x4x256xf32, #tpu.memory_space<vmem>>, vector<1x4x256xf32>
    %30 = vector.shape_cast %29 : vector<1x4x256xf32> to vector<4x256xf32>
    %31 = vector.shape_cast %28 : vector<4x256xf32> to vector<1x4x256xf32>
    tpu.vector_store %arg4[%c0_13, %c0_14, %c0_15], %31 {strides = array<i32>} : memref<1x4x256xf32, #tpu.memory_space<vmem>>, vector<1x4x256xf32>,
    return
  }
  func.func @transform_0(%arg0: i32) -> (i32, i32, i32) {
    %c0_i32 = arith.constant 0 : i32
    %c0_i32_0 = arith.constant 0 : i32
    %c0_i32_1 = arith.constant 0 : i32
    return %arg0, %c0_i32, %c0_i32_0 : i32, i32, i32
  }
  func.func @transform_1(%arg0: i32) -> (i32, i32, i32) {
    %c0_i32 = arith.constant 0 : i32
    %c0_i32_0 = arith.constant 0 : i32
    %c0_i32_1 = arith.constant 0 : i32
    return %arg0, %c0_i32, %c0_i32_0 : i32, i32, i32
  }
  func.func @transform_2(%arg0: i32) -> (i32, i32, i32) {
    %c0_i32 = arith.constant 0 : i32
    %c0_i32_0 = arith.constant 0 : i32
    %c0_i32_1 = arith.constant 0 : i32
    return %arg0, %c0_i32, %c0_i32_0 : i32, i32, i32
  }
  func.func @transform_3(%arg0: i32) -> (i32, i32, i32) {
    %c0_i32 = arith.constant 0 : i32
    %c0_i32_0 = arith.constant 0 : i32
    %c0_i32_1 = arith.constant 0 : i32
    return %arg0, %c0_i32, %c0_i32_0 : i32, i32, i32
  }
}

</mosaic_0001>

<bundles_post_ra>
// kernel: tpu_custom_call.1
= control target key start
LH: loop header
LB: loop body
LE: loop exit
PB: predicated region body
PF: predicated region fallthrough
CT: control target
= control target key end

     0   :  { %8 = vsyncpa [#allocation3], 0  ;;  %s620_s0 = inlined_call_operand.vmem [shape: f32[2,4,256], index: 0, kind: input, shape index: {}]   ;;  %s621_s1 = inlined_call_operand.vmem [shape: f32[2,4,1], index: 1, kind: input, shape index: {}]   ;;  %s622_s2 = inlined_call_operand.vmem [shape: f32[2,4,1], index: 2, kind: input, shape index: {}]   ;;  %s623_s3 = inlined_call_operand.hbm [shape: f32[2,4,256], index: 3, kind: output, shape index: {}]  }
   0x1   :  { %10 = vsyncpa [#allocation3 + $0x1], 0  ;;  %s523_s12 = smov 0   ;;  %s525_s13 = smov 0  }
   0x2   :  { %s527_s14 = smov 0   ;;  %s529_s15 = smov 0  }
   0x3 LB: > { %s544_s16 = sadd.s32 4294967295, %s498_s15   ;;  %s374_s17 = sadd.s32 4294967294, %s498_s15   ;;  %s498_s15 = sphi %s529_s15, %s629_s15   ;;  %s494_s14 = sphi %s527_s14, %s628_s14   ;;  %s490_s13 = sphi %s525_s13, %s627_s13   ;;  %s486_s12 = sphi %s523_s12, %s626_s12  }
   0x4   : > { %s548_s18 = sadd.s32 1, %s498_s15   ;;  %s101_s19 = sadd.s32 1, %s494_s14 }
   0x5   : > { %s98_s20 = ssub.s32 %s498_s15, %s548_s18  ;;  %p111_p0 = scmp.ne.s32.totalorder %s494_s14, %s490_s13 }
   0x6   : > { %p99_p1 = scmp.eq.s32.totalorder %s98_s20, 0  ;;  %p112_p2 = scmp.eq.s32.totalorder %s544_s16, 1 }
   0x7   : > { %p117_p3 = scmp.ne.s32.totalorder %s490_s13, %s486_s12  ;;  %p118_p4 = scmp.eq.s32.totalorder %s374_s17, 1 }
   0x8   : > { %s559_s21 = scalar_select %p99_p1, %s494_s14, %s101_s19  }
   0x9   : > { %p561_p5 = por %p112_p2, %p111_p0  ;;  %p565_p6 = por %p118_p4, %p117_p3 }
   0xa   : > { %p377_p7 = scmp.ge.s32.totalorder %s498_s15, 1  ;;  %p158_p8 = scmp.lt.s32.totalorder %s498_s15, 3 }
   0xc   : > { %p159_p9 = pnand %p377_p7, %p158_p8 }
   0xd   : > { %p190_p10 = scmp.lt.s32.totalorder (!%p159_p9), %s544_s16, 1  ;;  %s187_s9 = sand.u32 (!%p159_p9), 1, %s490_s13  }
   0xe   : > { %162 = sbr.rel (%p159_p9) target bundleno = 358 (0x166), region = 32  ;;  %s378_s10 = sshll.u32 (!%p159_p9), %s187_s9, 3 }
   0xf   : > { %s389_s11 = sshll.u32 (!%p159_p9), %s544_s16, 7  ;;  %s189_s17 = scalar_lea.vmem (!%p159_p9), [#allocation2], %s378_s10 }
  0x10   : > { %s291_s19 = sshll.u32 (!%p159_p9), %s189_s17, 4  ;;  %s277_s26 = scalar_lea.sflag (!%p159_p9), [#allocation3], %s187_s9  ;;  %s292_s19 = int_to_ptr.vmem [resolvable:$true] %s291_s19 }
  0x11   : > { %s438_s27 = scalar_lea.vmem (!%p159_p9), %s292_s19, 128 }
  0x12   : > { %p439_p11 = scmp.ne.s32.totalorder (!%p159_p9), %s292_s19, %s438_s27 }
  0x13   : > { %s573_s24 = scalar_select %p190_p10, %s544_s16, 1  ;;  %vm209_vm0 = vcmask 1043456   ;;  %v500_v10 = vmov 0   ;;  %v501_v28 = vmov 839922192   ;;  %v243_v30 = vlaneseq }
  0x14   : > { %431 = vset.pattern.permute.xlu1 %v500_v10  ;;  %432 = vset.pattern.permute.xlu0 %v500_v10  ;;  %v241_v29 = vunpack.c.l.s4 %v501_v28  ;;  %p440_p12 = pnand %p439_p11, %p561_p5 }
  0x15   : > { %s388_s25 = sshll.u32 %s573_s24, 3  ;;  %s381_s29 = sshll.u32 %s573_s24, 2  ;;  %v244_v32 = vshrl.u32 %v243_v30, 7 }
  0x16   : > { %s194_s28 = scalar_lea.vmem %s620_s0, %s388_s25  ;;  %s198_s5 = scalar_lea.vmem %s621_s1, %s381_s29  ;;  %v242_v31 = vunpack.c.0.s8 %v241_v29 }
  0x17   : > { %v203_v0 = vld [vmem:[%s194_s28] sm:$0xff]  ;;  %s202_s8 = scalar_lea.vmem %s622_s2, %s381_s29  ;;  %s289_s25 = scalar_lea.hbm %s623_s3, %s389_s11 }
  0x18   : > { %v207_v1 = vcombine.high %v203_v0, %v203_v0  ;;  %v210_v2 = vsel %vm209_vm0, %v203_v0, 0.0  ;;  %v215_v3 = vmul.f32 %v203_v0, %v203_v0  ;;  %v204_v24 = vld [vmem:[%s198_s5] sm:$0xf]  ;;  %v245_v33 = vsub.s32 %v242_v31, %v244_v32  ;;  %p441_p13 = pneg %p440_p12  ;;  %s502_s28 = smov [#allocation2]  }
  0x19   : > { %v205_v27 = vld [vmem:[%s202_s8] sm:$0xf]  ;;  %s442_s29 = sshll.u32 %s502_s28, 4  ;;  %s443_s29 = int_to_ptr.vmem [resolvable:$false] %s442_s29 }
  0x1a   : > { %v211_v4 = vsel %vm209_vm0, %v207_v1, 0.0  ;;  %v217_v5 = vcombine.high %v215_v3, %v215_v3  ;;  %v219_v6 = vsel %vm209_vm0, %v215_v3, 0.0  ;;  %s444_s16 = scalar_lea.vmem %s443_s29, 256  ;;  %p445_p0 = scmp.lt.s32.totalorder %s292_s19, %s443_s29 }
  0x1b   : > { %v212_v7 = vadd.f32 %v211_v4, %v210_v2  ;;  %p446_p1 = scmp.lt.s32.totalorder %s444_s16, %s438_s27 }
  0x1c   : > { %v220_v8 = vsel %vm209_vm0, %v217_v5, 0.0 }
  0x1d   : > { %213 = vadd.xlane.f32.xlu0 %v212_v7  ;;  %v221_v9 = vadd.f32 %v220_v8, %v219_v6  ;;  %p447_p2 = por %p446_p1, %p445_p0 }
  0x1f   : > { %p448_p3 = pnand %p447_p2, %p441_p13 }
  0x21   : > { %222 = vadd.xlane.f32.xlu0 %v221_v9 }
  0xa6   : > { %v214_v11 = vpop.xlane.xlu0 %213 }
  0xa7   : > { %v224_v12 = vmul.f32 0.00390625, %v214_v11 }
  0xa9   : > { %v225_v13 = vmul.f32 %v224_v12, %v214_v11  ;;  %v246_v34 = vrot.slane %v224_v12, %v245_v33 }
  0xaa   : > { %v223_v14 = vpop.xlane.xlu0 %222 }
  0xab   : > { %v226_v15 = vsub.f32 %v223_v14, %v225_v13  ;;  %v248_v37 = vsub.f32 %v203_v0, %v246_v34 }
  0xad   : > { %v227_v16 = vmax.f32 %v226_v15, 0.0 }
  0xaf   : > { %v228_v17 = vmul.f32 0.003921569, %v227_v16 }
  0xb1   : > { %434 = vrsqrt.f32 %v228_v17  ;;  %vm231_vm1 = vcmp.eq.f32.partialorder %v228_v17, inf  ;;  %v234_v20 = vand.u32 2147483648, %v228_v17  ;;  %vm233_vm2 = vcmp.eq.f32.partialorder %v228_v17, 0.0 }
  0xbe   : > { %v435_v18 = vpop.eup %434 }
  0xbf   : > { %v230_v19 = vmul.f32 %v435_v18, %v228_v17 }
  0xc1   : > { %v232_v21 = vsel %vm231_vm1, %v228_v17, %v230_v19 }
  0xc2   : > { %v235_v22 = vsel %vm233_vm2, %v234_v20, %v232_v21 }
  0xc3   : > { %v236_v23 = vadd.f32 1e-05, %v235_v22 }
  0xc5   : > { %436 = vrcp.f32 %v236_v23 }
  0xd2   : > { %v437_v25 = vpop.eup %436 }
  0xd3   : > { %v238_v26 = vmul.f32 %v437_v25, %v204_v24 }
  0xd5   : > { %251 = vperm.xlu1 %431, %v238_v26  }
  0xd9   : > { %264 = vperm.xlu1 %431, %v205_v27  }
 0x150   : > { %v252_v35 = vpop.permute.xlu1 %251 }
 0x151   : > { %v259_v36 = vrot.slane %v252_v35, %v245_v33 }
 0x153   : > { %v261_v39 = vmul.f32 %v259_v36, %v248_v37 }
 0x154   : > { %v265_v38 = vpop.permute.xlu1 %264 }
 0x155   : > { %v272_v40 = vrot.slane %v265_v38, %v245_v33 }
 0x157   : > { %v274_v41 = vadd.f32 %v272_v40, %v261_v39 }
 0x159   : > { %275 = vst [vmem:[%s189_s17] sm:$0xff] %v274_v41 }
 0x15a   : > { %451 = shalt.err (!%p448_p3)
}
 0x15b   : > { %s452_s30 = scalar_lea.hbm %s289_s25, 128  ;;  %s456_s6 = scalar_lea.hbm %s623_s3, 256 }
 0x15c   : > { %p453_p4 = scmp.ne.s32.totalorder %s289_s25, %s452_s30  ;;  %p457_p9 = scmp.lt.s32.totalorder %s289_s25, %s623_s3 }
 0x15d   : > { %p458_p10 = scmp.lt.s32.totalorder %s456_s6, %s452_s30 }
 0x15e   : > { %p454_p7 = pnand %p453_p4, %p561_p5 }
 0x15f   : > { %p459_p11 = por %p458_p10, %p457_p9 }
 0x160   : > { %p455_p8 = pneg %p454_p7 }
 0x162   : > { %p460_p12 = pnand %p459_p11, %p455_p8 }
 0x164   : > { %463 = shalt.err (!%p460_p12)
}
 0x165   : > { %390 = dma.vmem_to_hbm [thread:$0]  (%p561_p5), %s292_s19, 128, %s289_s25, %s277_s26  }
 0x166 PF: > { %p396_p13 = scmp.ge.s32.totalorder %s498_s15, 2  ;;  %s303_s9 = sand.u32 1, %s486_s12  }
 0x167   : > { %s304_s10 = scalar_lea.sflag [#allocation3], %s303_s9 }
 0x168   : > { %p393_p0 = pnand %p396_p13, %p565_p6 }
 0x16a   : > { %p394_p1 = pneg %p393_p0 }
 0x16c   : > { %481 = dma.done.wait (%p394_p1), %s304_s10, 128  }
 0x16d   : > { %483 = vsyncadd (%p394_p1), %s304_s10, 4294967168  ;;  %p13_p2 = scmp.ge.s32.totalorder %s548_s18, 4   ;;  %s626_s12 = smov %s490_s13 }
 0x16e   : > { %s627_s13 = smov %s494_s14  ;;  %s628_s14 = smov %s559_s21 }
 0x16f   : > { %s629_s15 = smov %s548_s18  ;;  %15 = sbr.rel (!%p13_p2) target bundleno = 3 (0x3), region = 73 }
 0x174   :  { %309 = vsyncpa [#allocation3], 1 }
 0x175   :  { %311 = vsyncpa [#allocation3 + $0x1], 1 }

</bundles_post_ra>
